<compile_context>
chip_gen: v7x
topology: tpu7x:2x2x1
jax: 0.10.0
libtpu: 0.0.40
codegen_flags: <defaults>
</compile_context>

<pallas_src>
import functools

import jax
import jax.numpy as jnp
from jax.experimental import pallas as pl
from jax.experimental.pallas import tpu as pltpu

_LANE = 128
_MIB = 1024 * 1024


def _round_up(n, m):
    return ((n + m - 1) // m) * m


def _pad2(a, rows, cols):
    r, c = a.shape
    if r == rows and c == cols:
        return a
    return jnp.pad(a, ((0, rows - r), (0, cols - c)))


def _pick_tile(n, candidates):
    for t in candidates:
        if t <= n and n % t == 0:
            return t
    return n


def _vmem_capacity_bytes():
    try:
        info = pltpu.get_tpu_info()
        cap = getattr(info, "vmem_capacity_bytes", None)
        if cap:
            return int(cap)
    except Exception:
        pass
    return 64 * _MIB   # assume v7x-sized VMEM when unknown (conservative)


def _generation_budgets():
    """Returns (fused_working_set_budget, fused_vmem_limit) in bytes."""
    cap = _vmem_capacity_bytes()
    if cap >= 96 * _MIB:
        # v5e / v6e: 128 MiB physical VMEM, single TensorCore -> fuse widely.
        return 64 * _MIB, 96 * _MIB
    # v7x (64 MiB physical, 2 TensorCores): prefer the tiled path, whose
    # "parallel" row axis shards across both cores, for anything but small N.
    return 16 * _MIB, 48 * _MIB


# -----------------------------------------------------------------------------
# Fused path: whole 2-layer forward in a single grid-less kernel invocation,
# adjacency DMA overlapped with the X @ W1 matmul.
# -----------------------------------------------------------------------------
def _gcn_fused_kernel(adj_hbm, x_ref, w1_ref, b1_ref, w3_ref, b3_ref, o_ref,
                      adj_vmem, sem):
    # Kick off the (dominant) adjacency DMA, then hide it behind X @ W1.
    cp = pltpu.make_async_copy(adj_hbm, adj_vmem, sem)
    cp.start()
    s1 = jnp.dot(x_ref[...], w1_ref[...],
                 preferred_element_type=jnp.float32).astype(jnp.bfloat16)
    cp.wait()
    adj = adj_vmem[...]                                           # bf16, resident
    h = jnp.dot(adj, s1, preferred_element_type=jnp.float32)
    h = jnp.maximum(h + b1_ref[...], 0.0)                         # bias + ReLU
    s3 = jnp.dot(h.astype(jnp.bfloat16), w3_ref[...],
                 preferred_element_type=jnp.float32).astype(jnp.bfloat16)
    out = jnp.dot(adj, s3, preferred_element_type=jnp.float32)
    o_ref[...] = (out + b3_ref[...]).astype(o_ref.dtype)


def _gcn_fused(adj, x, w1, b1, w3, b3, *, vmem_limit):
    n = adj.shape[0]
    f = x.shape[1]
    h = w1.shape[1]
    op = w3.shape[1]
    vmem = pltpu.MemorySpace.VMEM
    flops = 2 * n * f * h + 2 * n * n * h + 2 * n * h * op + 2 * n * n * op
    bytes_accessed = (n * n * 2 + n * f * 2 + f * h * 2 + h * op * 2
                      + n * op * 4)
    return pl.pallas_call(
        _gcn_fused_kernel,
        out_shape=jax.ShapeDtypeStruct((n, op), jnp.float32),
        in_specs=[
            pl.BlockSpec(memory_space=pl.ANY),   # adj stays in HBM, manual DMA
            pl.BlockSpec(memory_space=vmem),     # x
            pl.BlockSpec(memory_space=vmem),     # w1
            pl.BlockSpec(memory_space=vmem),     # b1
            pl.BlockSpec(memory_space=vmem),     # w3
            pl.BlockSpec(memory_space=vmem),     # b3
        ],
        out_specs=pl.BlockSpec(memory_space=vmem),
        scratch_shapes=[pltpu.VMEM((n, n), jnp.bfloat16),
                        pltpu.SemaphoreType.DMA],
        compiler_params=pltpu.CompilerParams(vmem_limit_bytes=int(vmem_limit)),
        cost_estimate=pl.CostEstimate(flops=flops, transcendentals=0,
                                      bytes_accessed=bytes_accessed),
    )(adj, x, w1, b1, w3, b3)


# -----------------------------------------------------------------------------
# Tiled path (large graphs): 3 kernels total.
#   1) support1 = X @ W1                 (row-parallel, feature axis on grid)
#   2) s3 = relu(adj @ support1 + b1) @ W3   (adj K on grid, W3 in finalize)
#   3) out = adj @ s3 + b3
# -----------------------------------------------------------------------------
def _xw_kernel(x_ref, w_ref, o_ref, acc_ref):
    @pl.when(pl.program_id(1) == 0)
    def _():
        acc_ref[...] = jnp.zeros_like(acc_ref)

    acc_ref[...] += jnp.dot(x_ref[...], w_ref[...],
                            preferred_element_type=jnp.float32)

    @pl.when(pl.program_id(1) == pl.num_programs(1) - 1)
    def _():
        o_ref[...] = acc_ref[...].astype(o_ref.dtype)


def _xw_matmul(x, w, *, tm, tf):
    n, f = x.shape
    h = w.shape[1]
    vmem_limit = int(2 * tm * tf * 2 + 2 * tf * h * 2 + tm * h * 4
                     + 2 * tm * h * 2 + 4 * _MIB)
    return pl.pallas_call(
        _xw_kernel,
        out_shape=jax.ShapeDtypeStruct((n, h), jnp.bfloat16),
        grid_spec=pltpu.PrefetchScalarGridSpec(
            num_scalar_prefetch=0,
            grid=(n // tm, f // tf),
            in_specs=[pl.BlockSpec((tm, tf), lambda i, k: (i, k)),
                      pl.BlockSpec((tf, h), lambda i, k: (k, 0))],
            out_specs=pl.BlockSpec((tm, h), lambda i, k: (i, 0)),
            scratch_shapes=[pltpu.VMEM((tm, h), jnp.float32)],
        ),
        compiler_params=pltpu.CompilerParams(
            dimension_semantics=("parallel", "arbitrary"),
            vmem_limit_bytes=vmem_limit),
        cost_estimate=pl.CostEstimate(
            flops=2 * n * f * h, transcendentals=0,
            bytes_accessed=n * f * 2 + f * h * 2 + n * h * 2),
    )(x, w)


def _adj_relu_w3_kernel(adj_ref, s_ref, b1_ref, w3_ref, o_ref, acc_ref):
    @pl.when(pl.program_id(1) == 0)
    def _():
        acc_ref[...] = jnp.zeros_like(acc_ref)

    acc_ref[...] += jnp.dot(adj_ref[...], s_ref[...],
                            preferred_element_type=jnp.float32)

    @pl.when(pl.program_id(1) == pl.num_programs(1) - 1)
    def _():
        # Layer-1 bias + ReLU and layer-3's (h @ W3) fused into the finalize:
        # h never round-trips through HBM.
        h = jnp.maximum(acc_ref[...] + b1_ref[...], 0.0)
        s3 = jnp.dot(h.astype(jnp.bfloat16), w3_ref[...],
                     preferred_element_type=jnp.float32)
        o_ref[...] = s3.astype(o_ref.dtype)


def _adj_relu_w3(adj, support, b1, w3, *, tm, tk):
    n = adj.shape[0]
    h = support.shape[1]
    op = w3.shape[1]
    vmem_limit = int(2 * tm * tk * 2 + 2 * tk * h * 2 + 2 * h * op * 2
                     + tm * h * 4 + 2 * tm * op * 2 + 4 * _MIB)
    return pl.pallas_call(
        _adj_relu_w3_kernel,
        out_shape=jax.ShapeDtypeStruct((n, op), jnp.bfloat16),
        grid_spec=pltpu.PrefetchScalarGridSpec(
            num_scalar_prefetch=0,
            grid=(n // tm, n // tk),
            in_specs=[pl.BlockSpec((tm, tk), lambda i, k: (i, k)),
                      pl.BlockSpec((tk, h), lambda i, k: (k, 0)),
                      pl.BlockSpec((1, h), lambda i, k: (0, 0)),
                      pl.BlockSpec((h, op), lambda i, k: (0, 0))],
            out_specs=pl.BlockSpec((tm, op), lambda i, k: (i, 0)),
            scratch_shapes=[pltpu.VMEM((tm, h), jnp.float32)],
        ),
        compiler_params=pltpu.CompilerParams(
            dimension_semantics=("parallel", "arbitrary"),
            vmem_limit_bytes=vmem_limit),
        cost_estimate=pl.CostEstimate(
            flops=2 * n * n * h + 2 * n * h * op, transcendentals=0,
            bytes_accessed=n * n * 2 + n * h * 2 + h * op * 2 + n * op * 2),
    )(adj, support, b1, w3)


def _adj_matmul_kernel(adj_ref, s_ref, b_ref, o_ref, acc_ref, *, apply_relu):
    @pl.when(pl.program_id(1) == 0)
    def _():
        acc_ref[...] = jnp.zeros_like(acc_ref)

    acc_ref[...] += jnp.dot(adj_ref[...], s_ref[...],
                            preferred_element_type=jnp.float32)

    @pl.when(pl.program_id(1) == pl.num_programs(1) - 1)
    def _():
        out = acc_ref[...] + b_ref[...]
        if apply_relu:
            out = jnp.maximum(out, 0.0)
        o_ref[...] = out.astype(o_ref.dtype)


def _adj_matmul(adj, support, b, *, apply_relu, tm, tk, out_dtype):
    n = adj.shape[0]
    h = support.shape[1]
    out_bytes = jnp.dtype(out_dtype).itemsize
    vmem_limit = int(2 * tm * tk * 2 + 2 * tk * h * 2 + tm * h * 4
                     + 2 * tm * h * out_bytes + 4 * _MIB)
    return pl.pallas_call(
        functools.partial(_adj_matmul_kernel, apply_relu=apply_relu),
        out_shape=jax.ShapeDtypeStruct((n, h), out_dtype),
        grid_spec=pltpu.PrefetchScalarGridSpec(
            num_scalar_prefetch=0,
            grid=(n // tm, n // tk),
            in_specs=[pl.BlockSpec((tm, tk), lambda i, k: (i, k)),
                      pl.BlockSpec((tk, h), lambda i, k: (k, 0)),
                      pl.BlockSpec((1, h), lambda i, k: (0, 0))],
            out_specs=pl.BlockSpec((tm, h), lambda i, k: (i, 0)),
            scratch_shapes=[pltpu.VMEM((tm, h), jnp.float32)],
        ),
        compiler_params=pltpu.CompilerParams(
            dimension_semantics=("parallel", "arbitrary"),
            vmem_limit_bytes=vmem_limit),
        cost_estimate=pl.CostEstimate(
            flops=2 * n * n * h, transcendentals=0,
            bytes_accessed=n * n * 2 + n * h * 2 + n * h * out_bytes),
    )(adj, support, b)


def _gcn_forward_tiled(adj_p, x_p, w1_p, b1_p, w3_p, b3_p):
    np_ = adj_p.shape[0]
    fp = x_p.shape[1]
    # Big, decoupled adj tiles: the adjacency stream is HBM-bound, so amortize
    # the per-grid-step overhead (~0.35 us) with ~MiB-scale blocks.
    tm = _pick_tile(np_, (1024, 512, 256, 128))
    tk = _pick_tile(np_, (2048, 1024, 512, 256, 128))
    tf = _pick_tile(fp, (2048, 1024, 512, 256, 128))
    support1 = _xw_matmul(x_p, w1_p, tm=tm, tf=tf)           # X @ W1, once
    s3 = _adj_relu_w3(adj_p, support1, b1_p, w3_p, tm=tm, tk=tk)
    return _adj_matmul(adj_p, s3, b3_p, apply_relu=False,
                       tm=tm, tk=tk, out_dtype=jnp.float32)


# -----------------------------------------------------------------------------
# Model wrapper
# -----------------------------------------------------------------------------
def init_gcn_homo_params(key, nfeat, nhid, nout):
    """Uniform(-stdv, stdv) init like the canonical GraphConvolution layer."""
    keys = jax.random.split(key, 6)

    def layer(kw, kb, fan_in, fan_out):
        stdv = 1.0 / jnp.sqrt(jnp.float32(fan_out))
        w = jax.random.uniform(kw, (fan_in, fan_out), jnp.float32, -stdv, stdv)
        b = jax.random.uniform(kb, (1, fan_out), jnp.float32, -stdv, stdv)
        return w, b

    w1, b1 = layer(keys[0], keys[1], nfeat, nhid)
    w2, b2 = layer(keys[2], keys[3], nhid, nhid)   # gc2: built but unused in forward
    w3, b3 = layer(keys[4], keys[5], nhid, nout)
    return {"w1": w1, "b1": b1, "w2": w2, "b2": b2, "w3": w3, "b3": b3}


def preprocess_adj(adj):
    """One-time pad to a 128-multiple + bf16 cast of the (constant) adjacency.

    Hoisted out of the forward so the full N^2 pad/convert pass is amortized
    across layers and across forward calls.
    """
    n = adj.shape[0]
    np_ = _round_up(n, _LANE)
    return _pad2(adj, np_, np_).astype(jnp.bfloat16)


def gcn_homo_forward(params, x, adj, bi_adj, output, *, dropout=0.5,
                     training=False, force_tiled=False):
    """Pallas forward for GCN_homo: relu(gc1(x)) -> dropout(eval) -> gc3."""
    n, f_in = x.shape
    nhid = params["w1"].shape[1]
    nout = params["w3"].shape[1]

    # TODO(synk): training-mode dropout between gc1 and gc3 is not implemented
    # (forward is exercised with eval semantics, where F.dropout is identity).
    del dropout, training, output

    fp = _round_up(f_in, _LANE)
    hp = _round_up(nhid, _LANE)
    op = _round_up(nout, _LANE)
    np_ = _round_up(n, _LANE)

    # Reuse an already-preprocessed adjacency (padded + bf16) if given.
    if adj.dtype == jnp.bfloat16 and adj.shape == (np_, np_):
        adj_p = adj
    else:
        adj_p = preprocess_adj(adj)

    # bf16 matmul operands at the pallas_call boundary; biases stay f32.
    x_p = _pad2(x, np_, fp).astype(jnp.bfloat16)
    w1_p = _pad2(params["w1"], fp, hp).astype(jnp.bfloat16)
    b1_p = _pad2(params["b1"], 1, hp).astype(jnp.float32)
    w3_p = _pad2(params["w3"], hp, op).astype(jnp.bfloat16)
    b3_p = _pad2(params["b3"], 1, op).astype(jnp.float32)

    fused_budget, fused_vmem_limit = _generation_budgets()
    # Fused single-invocation working set: adj VMEM scratch + inputs/output
    # + f32 intermediates (s1/h/s3/out) + transient bf16 copies.
    fused_bytes = (np_ * np_ * 2 + np_ * fp * 2 + fp * hp * 2 + hp * op * 2
                   + np_ * op * 4 + 4 * np_ * max(hp, op) * 4
                   + 2 * np_ * max(hp, op) * 2)
    use_fused = (not force_tiled) and fused_bytes <= fused_budget

    if use_fused:
        out_p = _gcn_fused(adj_p, x_p, w1_p, b1_p, w3_p, b3_p,
                           vmem_limit=fused_vmem_limit)
    else:
        out_p = _gcn_forward_tiled(adj_p, x_p, w1_p, b1_p, w3_p, b3_p)

    x3 = out_p[:n, :nout]
    mask = bi_adj   # TODO(synk): pass-through until GraphConvolution_homo spec known
    return x3, mask


# -----------------------------------------------------------------------------
# Self-test
# -----------------------------------------------------------------------------
def _reference_forward(params, x, adj):
    h = jnp.maximum(adj @ (x @ params["w1"]) + params["b1"], 0.0)
    return adj @ (h @ params["w3"]) + params["b3"]


def _make_norm_adj(key, n, p):
    a = (jax.random.uniform(key, (n, n)) < p).astype(jnp.float32)
    a = jnp.maximum(a, a.T) + jnp.eye(n, dtype=jnp.float32)
    d_inv_sqrt = 1.0 / jnp.sqrt(jnp.sum(a, axis=1))
    return a * d_inv_sqrt[:, None] * d_inv_sqrt[None, :]


if __name__ == "__main__":
    key = jax.random.PRNGKey(0)
    k_x, k_adj, k_bi, k_param, k_big = jax.random.split(key, 5)

    # ---- small example (fused single-invocation path) ----
    N, NFEAT, NHID, NOUT, M = 64, 32, 32, 16, 32

    x = jax.random.normal(k_x, (N, NFEAT), jnp.float32)
    adj = _make_norm_adj(k_adj, N, 0.1)
    bi_adj = (jax.random.uniform(k_bi, (N, M)) < 0.2).astype(jnp.float32)
    output_arg = jnp.zeros((N, NOUT), jnp.float32)
    params = init_gcn_homo_params(k_param, NFEAT, NHID, NOUT)

    adj_pre = preprocess_adj(adj)   # hoisted one-time pad + bf16 cast
    x3, mask = gcn_homo_forward(params, x, adj_pre, bi_adj, output_arg,
                                dropout=0.5, training=False)
    jax.block_until_ready((x3, mask))

    ref = _reference_forward(params, x, adj)
    assert x3.shape == (N, NOUT)
    assert mask.shape == bi_adj.shape
    assert bool(jnp.allclose(x3, ref, rtol=5e-2, atol=5e-2)), "fused path mismatch"

    # ---- larger graph exercising the scalable tiled path ----
    N2, F2, H2, O2 = 256, 64, 64, 32
    kx2, ka2, kp2 = jax.random.split(k_big, 3)
    x2 = jax.random.normal(kx2, (N2, F2), jnp.float32)
    adj2 = _make_norm_adj(ka2, N2, 0.05)
    params2 = init_gcn_homo_params(kp2, F2, H2, O2)
    bi2 = jnp.zeros((N2, 8), jnp.float32)
    out2_arg = jnp.zeros((N2, O2), jnp.float32)

    y2, _ = gcn_homo_forward(params2, x2, adj2, bi2, out2_arg, force_tiled=True)
    jax.block_until_ready(y2)
    ref2 = _reference_forward(params2, x2, adj2)
    assert y2.shape == (N2, O2)
    assert bool(jnp.allclose(y2, ref2, rtol=5e-2, atol=5e-2)), "tiled path mismatch"

    print("KERNEL_OK")
</pallas_src>

<mosaic_0001>
module attributes {stable_mosaic.version = 11 : i64} {
  func.func @_gcn_fused_kernel(%arg0: memref<128x128xbf16, #tpu.memory_space<any>>, %arg1: memref<128x128xbf16, #tpu.memory_space<vmem>>, %arg2: memref<128x128xbf16, #tpu.memory_space<vmem>>, %arg3: memref<1x128xf32, #tpu.memory_space<vmem>>, %arg4: memref<128x128xbf16, #tpu.memory_space<vmem>>, %arg5: memref<1x128xf32, #tpu.memory_space<vmem>>, %arg6: memref<128x128xf32, #tpu.memory_space<vmem>>, %arg7: memref<128x128xbf16, #tpu.memory_space<vmem>>, %arg8: memref<!tpu.dma_semaphore, #tpu.memory_space<semaphore_mem>>) attributes {dimension_semantics = [], scalar_prefetch = 0 : i64, scratch_operands = 2 : i64, tpu.core_type = #tpu.core_type<tc>} {
    tpu.enqueue_dma source(%arg0 : memref<128x128xbf16, #tpu.memory_space<any>>) target(%arg7 : memref<128x128xbf16, #tpu.memory_space<vmem>>) target_semaphore(%arg8 : memref<!tpu.dma_semaphore, #tpu.memory_space<semaphore_mem>>)
    %c0 = arith.constant 0 : index
    %c0_0 = arith.constant 0 : index
    %0 = vector.load %arg1[%c0, %c0_0] : memref<128x128xbf16, #tpu.memory_space<vmem>>, vector<128x128xbf16>
    %c0_1 = arith.constant 0 : index
    %c0_2 = arith.constant 0 : index
    %1 = vector.load %arg2[%c0_1, %c0_2] : memref<128x128xbf16, #tpu.memory_space<vmem>>, vector<128x128xbf16>
    %cst = arith.constant dense<0.000000e+00> : vector<128x128xf32>
    %2 = tpu.matmul %0, %1, %cst {dimension_numbers = #tpu.dot_dimension_numbers<[1], [0], [0], [1], [0, 0, 1, 1], [], []>} : vector<128x128xbf16>, vector<128x128xbf16>, vector<128x128xf32> -> vector<128x128xf32>
    %3 = arith.truncf %2 : vector<128x128xf32> to vector<128x128xbf16>
    tpu.wait_dma2 semaphore(%arg8 : memref<!tpu.dma_semaphore, #tpu.memory_space<semaphore_mem>>) src(%arg0 : memref<128x128xbf16, #tpu.memory_space<any>>) dst(%arg7 : memref<128x128xbf16, #tpu.memory_space<vmem>>)
    %c0_3 = arith.constant 0 : index
    %c0_4 = arith.constant 0 : index
    %4 = vector.load %arg7[%c0_3, %c0_4] : memref<128x128xbf16, #tpu.memory_space<vmem>>, vector<128x128xbf16>
    %cst_5 = arith.constant dense<0.000000e+00> : vector<128x128xf32>
    %5 = tpu.matmul %4, %3, %cst_5 {dimension_numbers = #tpu.dot_dimension_numbers<[1], [0], [0], [1], [0, 0, 1, 1], [], []>} : vector<128x128xbf16>, vector<128x128xbf16>, vector<128x128xf32> -> vector<128x128xf32>
    %c0_6 = arith.constant 0 : index
    %c0_7 = arith.constant 0 : index
    %6 = vector.load %arg3[%c0_6, %c0_7] : memref<1x128xf32, #tpu.memory_space<vmem>>, vector<1x128xf32>
    %7 = vector.broadcast %6 : vector<1x128xf32> to vector<128x128xf32>
    %8 = arith.addf %5, %7 : vector<128x128xf32>
    %cst_8 = arith.constant 0.000000e+00 : f32
    %9 = vector.broadcast %cst_8 : f32 to vector<128x128xf32>
    %10 = arith.maximumf %8, %9 : vector<128x128xf32>
    %11 = arith.truncf %10 : vector<128x128xf32> to vector<128x128xbf16>
    %c0_9 = arith.constant 0 : index
    %c0_10 = arith.constant 0 : index
    %12 = vector.load %arg4[%c0_9, %c0_10] : memref<128x128xbf16, #tpu.memory_space<vmem>>, vector<128x128xbf16>
    %cst_11 = arith.constant dense<0.000000e+00> : vector<128x128xf32>
    %13 = tpu.matmul %11, %12, %cst_11 {dimension_numbers = #tpu.dot_dimension_numbers<[1], [0], [0], [1], [0, 0, 1, 1], [], []>} : vector<128x128xbf16>, vector<128x128xbf16>, vector<128x128xf32> -> vector<128x128xf32>
    %14 = arith.truncf %13 : vector<128x128xf32> to vector<128x128xbf16>
    %cst_12 = arith.constant dense<0.000000e+00> : vector<128x128xf32>
    %15 = tpu.matmul %4, %14, %cst_12 {dimension_numbers = #tpu.dot_dimension_numbers<[1], [0], [0], [1], [0, 0, 1, 1], [], []>} : vector<128x128xbf16>, vector<128x128xbf16>, vector<128x128xf32> -> vector<128x128xf32>
    %c0_13 = arith.constant 0 : index
    %c0_14 = arith.constant 0 : index
    %16 = vector.load %arg5[%c0_13, %c0_14] : memref<1x128xf32, #tpu.memory_space<vmem>>, vector<1x128xf32>
    %17 = vector.broadcast %16 : vector<1x128xf32> to vector<128x128xf32>
    %18 = arith.addf %15, %17 : vector<128x128xf32>
    %c0_15 = arith.constant 0 : index
    %c0_16 = arith.constant 0 : index
    %19 = vector.load %arg6[%c0_15, %c0_16] : memref<128x128xf32, #tpu.memory_space<vmem>>, vector<128x128xf32>
    tpu.vector_store %arg6[%c0_15, %c0_16], %18 {strides = array<i32>} : memref<128x128xf32, #tpu.memory_space<vmem>>, vector<128x128xf32>,
    return
  }
}

</mosaic_0001>

<bundles_post_ra>
// kernel: tpu_custom_call.1
= control target key start
LH: loop header
LB: loop body
LE: loop exit
PB: predicated region body
PF: predicated region fallthrough
CT: control target
= control target key end

     0   :  { %11 = vsyncpa [#allocation5], 0  ;;  %s1285_s0 = inlined_call_operand.hbm [shape: bf16[128,128], index: 0, kind: input, shape index: {}]   ;;  %s1286_s1 = inlined_call_operand.hbm [shape: bf16[128,128], index: 1, kind: input, shape index: {}]   ;;  %s1287_s2 = inlined_call_operand.hbm [shape: bf16[128,128], index: 2, kind: input, shape index: {}]   ;;  %s1288_s3 = inlined_call_operand.vmem [shape: f32[1,128], index: 3, kind: input, shape index: {}]   ;;  %s1289_s4 = inlined_call_operand.hbm [shape: bf16[128,128], index: 4, kind: input, shape index: {}]   ;;  %s1290_s5 = inlined_call_operand.vmem [shape: f32[1,128], index: 5, kind: input, shape index: {}]   ;;  %s1291_s6 = inlined_call_operand.hbm [shape: f32[128,128], index: 6, kind: output, shape index: {}]  }
   0x1   :  { %12 = vsyncpa [#allocation8], 0 }
   0x2   :  { %13 = vsyncpa [#allocation6], 0  ;;  %s1131_s21 = smov [#allocation7]   ;;  %s1132_s23 = smov [#allocation4]  }
   0x3   :  { %s31_s22 = sshll.u32 %s1131_s21, 4  ;;  %s19_s24 = sshll.u32 %s1132_s23, 4  ;;  %s32_s22 = int_to_ptr.vmem [resolvable:$true] %s31_s22  ;;  %s1175_s24 = int_to_ptr.vmem [resolvable:$true] %s19_s24 }
   0x4   :  { %s1013_s27 = scalar_lea.hbm %s1287_s2, 1024 }
   0x5   :  { %p1014_p0 = scmp.ne.s32.totalorder %s1287_s2, %s1013_s27  ;;  %p1017_p1 = scmp.lt.u32.totalorder %s1013_s27, %s1287_s2 }
   0x7   :  { %p1019_p2 = pnand %p1017_p1, %p1014_p0 }
   0x9   :  { %1022 = shalt.err (!%p1019_p2)
}
   0xa   :  { %s1023_s8 = scalar_lea.vmem %s32_s22, 1024  ;;  %p1028_p4 = scmp.lt.s32.totalorder %s32_s22, %s32_s22 }
   0xb   :  { %p1024_p3 = scmp.ne.s32.totalorder %s32_s22, %s1023_s8  ;;  %p1029_p5 = scmp.lt.s32.totalorder %s1023_s8, %s1023_s8 }
   0xd   :  { %p1030_p6 = por %p1029_p5, %p1028_p4 }
   0xf   :  { %p1031_p7 = pnand %p1030_p6, %p1024_p3 }
  0x11   :  { %1034 = shalt.err (!%p1031_p7)
}
  0x12   :  { %s1133_s9 = smov 64   ;;  %s1134_s10 = smov 4  }
  0x13   :  { %37 = dma.hbm_to_vmem [thread:$0]  %s1287_s2, 1024, %s32_s22, [#allocation8], %s1133_s9, %s1133_s9, %s1134_s10  }
  0x14   :  { %s1035_s15 = scalar_lea.hbm %s1286_s1, 1024 }
  0x15   :  { %p1036_p8 = scmp.ne.s32.totalorder %s1286_s1, %s1035_s15  ;;  %p1039_p9 = scmp.lt.u32.totalorder %s1035_s15, %s1286_s1 }
  0x17   :  { %p1041_p10 = pnand %p1039_p9, %p1036_p8 }
  0x19   :  { %1044 = shalt.err (!%p1041_p10)
}
  0x1a   :  { %s1045_s20 = scalar_lea.vmem %s1175_s24, 1024  ;;  %p1050_p12 = scmp.lt.s32.totalorder %s1175_s24, %s1175_s24 }
  0x1b   :  { %p1046_p11 = scmp.ne.s32.totalorder %s1175_s24, %s1045_s20  ;;  %p1051_p13 = scmp.lt.s32.totalorder %s1045_s20, %s1045_s20 }
  0x1d   :  { %p1052_p0 = por %p1051_p13, %p1050_p12 }
  0x1f   :  { %p1053_p1 = pnand %p1052_p0, %p1046_p11 }
  0x21   :  { %1056 = shalt.err (!%p1053_p1)
}
  0x22   :  { %25 = dma.hbm_to_vmem [thread:$0]  %s1286_s1, 1024, %s1175_s24, [#allocation5], %s1133_s9, %s1133_s9, %s1134_s10  }
  0x23   :  { %s1135_s22 = smov [#allocation9]   ;;  %s1057_s27 = scalar_lea.hbm %s1289_s4, 1024 }
  0x24   :  { %s45_s23 = sshll.u32 %s1135_s22, 4  ;;  %p1058_p2 = scmp.ne.s32.totalorder %s1289_s4, %s1057_s27  ;;  %s46_s23 = int_to_ptr.vmem [resolvable:$true] %s45_s23 }
  0x25   :  { %p1061_p3 = scmp.lt.u32.totalorder %s1057_s27, %s1289_s4 }
  0x27   :  { %p1063_p4 = pnand %p1061_p3, %p1058_p2 }
  0x29   :  { %1066 = shalt.err (!%p1063_p4)
}
  0x2a   :  { %s1067_s8 = scalar_lea.vmem %s46_s23, 1024  ;;  %p1072_p6 = scmp.lt.s32.totalorder %s46_s23, %s46_s23 }
  0x2b   :  { %p1068_p5 = scmp.ne.s32.totalorder %s46_s23, %s1067_s8  ;;  %p1073_p7 = scmp.lt.s32.totalorder %s1067_s8, %s1067_s8 }
  0x2d   :  { %p1074_p8 = por %p1073_p7, %p1072_p6 }
  0x2f   :  { %p1075_p9 = pnand %p1074_p8, %p1068_p5 }
  0x31   :  { %1078 = shalt.err (!%p1075_p9)
}
  0x32   :  { %51 = dma.hbm_to_vmem [thread:$0]  %s1289_s4, 1024, %s46_s23, [#allocation8], %s1133_s9, %s1133_s9, %s1134_s10  }
  0x33   :  { %1123 = dma.done.wait [#allocation5], 1024  }
  0x34   :  { %1124 = vsyncadd [#allocation5], 4294966272 }
  0x35   :  { %1125 = dma.done.wait [#allocation8], 2048  }
  0x36   :  { %1126 = vsyncadd [#allocation8], 4294965248  ;;  %v989_v0 = vld [vmem:[#allocation7] sm:$0xff]   ;;  %v990_v1 = vld [vmem:[#allocation7 + $0x8] sm:$0xff]   ;;  %s1136_s4 = smov [#allocation2]   ;;  %s1079_s12 = scalar_lea.hbm %s1285_s0, 1024 }
  0x37   :  { %852 = vmatprep.subr.bf16.mxu0 %v989_v0  ;;  %v991_v2 = vld [vmem:[#allocation7 + $0x10] sm:$0xff]   ;;  %v992_v3 = vld [vmem:[#allocation7 + $0x18] sm:$0xff]   ;;  %v997_v4 = vld [vmem:[#allocation4] sm:$0xff]   ;;  %s71_s9 = sshll.u32 %s1136_s4, 4  ;;  %p1080_p10 = scmp.ne.s32.totalorder %s1285_s0, %s1079_s12  ;;  %s72_s9 = int_to_ptr.vmem [resolvable:$true] %s71_s9 }
  0x38   :  { %853 = vmatpush3.bf16.msra.mxu0 %v989_v0  ;;  %868 = vmatprep.mubr.bf16.mxu0 %v997_v4  ;;  %v993_v5 = vld [vmem:[#allocation7 + $0x20] sm:$0xff]   ;;  %v994_v6 = vld [vmem:[#allocation7 + $0x28] sm:$0xff]   ;;  %v995_v7 = vld [vmem:[#allocation7 + $0x30] sm:$0xff]   ;;  %p1083_p11 = scmp.lt.u32.totalorder %s1079_s12, %s1285_s0 }
  0x39   :  { %854 = vmatprep.subr.bf16.mxu0 %v990_v1  ;;  %v996_v8 = vld [vmem:[#allocation7 + $0x38] sm:$0xff]   ;;  %v998_v9 = vld [vmem:[#allocation4 + $0x8] sm:$0xff]   ;;  %v999_v10 = vld [vmem:[#allocation4 + $0x10] sm:$0xff]  }
  0x3a   :  { %v1000_v11 = vld [vmem:[#allocation4 + $0x18] sm:$0xff]   ;;  %v1001_v12 = vld [vmem:[#allocation4 + $0x20] sm:$0xff]   ;;  %v1002_v13 = vld [vmem:[#allocation4 + $0x28] sm:$0xff]   ;;  %p1085_p12 = pnand %p1083_p11, %p1080_p10 }
  0x3b   :  { %v1003_v14 = vld [vmem:[#allocation4 + $0x30] sm:$0xff]   ;;  %v1004_v15 = vld [vmem:[#allocation4 + $0x38] sm:$0xff]  }
  0x3c   :  { %855 = vmatpush3.bf16.msra.mxu0 %v990_v1 }
  0x3d   :  { %856 = vmatprep.subr.bf16.mxu0 %v991_v2 }
  0x40   :  { %857 = vmatpush3.bf16.msra.mxu0 %v991_v2 }
  0x41   :  { %858 = vmatprep.subr.bf16.mxu0 %v992_v3 }
  0x44   :  { %859 = vmatpush3.bf16.msra.mxu0 %v992_v3 }
  0x45   :  { %860 = vmatprep.subr.bf16.mxu0 %v993_v5 }
  0x48   :  { %861 = vmatpush3.bf16.msra.mxu0 %v993_v5 }
  0x49   :  { %862 = vmatprep.subr.bf16.mxu0 %v994_v6 }
  0x4c   :  { %863 = vmatpush3.bf16.msra.mxu0 %v994_v6 }
  0x4d   :  { %864 = vmatprep.subr.bf16.mxu0 %v995_v7 }
  0x50   :  { %865 = vmatpush3.bf16.msra.mxu0 %v995_v7 }
  0x51   :  { %866 = vmatprep.subr.bf16.mxu0 %v996_v8 }
  0x54   :  { %867 = vmatpush3.bf16.msra.mxu0 %v996_v8 }
  0x57   :  { %869 = vmatmul.mubr.bf16.vlgmr.msra.gmra.mrb[0].mxu0 %v998_v9 }
  0x58   :  { %872 = vmatprep.mubr.bf16.mxu0 %v999_v10 }
  0x5f   :  { %873 = vmatmul.mubr.bf16.gmra.mrb[4].mxu0 %v1000_v11 }
  0x60   :  { %876 = vmatprep.mubr.bf16.mxu0 %v1001_v12 }
  0x67   :  { %877 = vmatmul.mubr.bf16.gmra.mrb[8].mxu0 %v1002_v13 }
  0x68   :  { %880 = vmatprep.mubr.bf16.mxu0 %v1003_v14 }
  0x6f   :  { %881 = vmatmul.mubr.bf16.gmra.mrb[12].mxu0 %v1004_v15 }
  0x70   :  { %1088 = shalt.err (!%p1085_p12)  }
  0x71   :  { %s1089_s17 = scalar_lea.vmem %s72_s9, 1024  ;;  %p1094_p0 = scmp.lt.s32.totalorder %s72_s9, %s72_s9 }
  0x72   :  { %p1090_p13 = scmp.ne.s32.totalorder %s72_s9, %s1089_s17  ;;  %p1095_p1 = scmp.lt.s32.totalorder %s1089_s17, %s1089_s17 }
  0x74   :  { %p1096_p2 = por %p1095_p1, %p1094_p0 }
  0x76   :  { %p1097_p3 = pnand %p1096_p2, %p1090_p13 }
  0x78   :  { %1100 = shalt.err (!%p1097_p3)  }
  0x79   :  { %74 = dma.hbm_to_vmem [thread:$0]  %s1285_s0, 1024, %s72_s9, [#allocation3] }
 0x12a   :  { %v870_v16 = vpop.f32.mrb[0].mxu0 }
 0x12b   :  { %v237_v17 = vpop.f32.mrb[1].mxu0 }
 0x12c   :  { %v871_v18 = vpop.f32.mrb[2].mxu0 }
 0x12d   :  { %v301_v19 = vpack.c.bf16 %v871_v18, %v870_v16  ;;  %v240_v20 = vpop.f32.mrb[3].mxu0 }
 0x12e   :  { %v300_v21 = vpack.c.bf16 %v240_v20, %v237_v17 }
 0x130   :  { %884 = vmatprep.subr.bf16.mxu1 %v300_v21 }
 0x132   :  { %v874_v22 = vpop.f32.mrb[4].mxu0 }
 0x133   :  { %v253_v23 = vpop.f32.mrb[5].mxu0 }
 0x134   :  { %v875_v24 = vpop.f32.mrb[6].mxu0 }
 0x135   :  { %v303_v25 = vpack.c.bf16 %v875_v24, %v874_v22  ;;  %v256_v26 = vpop.f32.mrb[7].mxu0 }
 0x136   :  { %v302_v27 = vpack.c.bf16 %v256_v26, %v253_v23 }
 0x13a   :  { %v878_v28 = vpop.f32.mrb[8].mxu0 }
 0x13b   :  { %v269_v29 = vpop.f32.mrb[9].mxu0 }
 0x13c   :  { %v879_v30 = vpop.f32.mrb[10].mxu0 }
 0x13d   :  { %v305_v31 = vpack.c.bf16 %v879_v30, %v878_v28  ;;  %v272_v32 = vpop.f32.mrb[11].mxu0 }
 0x13e   :  { %v304_v33 = vpack.c.bf16 %v272_v32, %v269_v29 }
 0x142   :  { %v882_v34 = vpop.f32.mrb[12].mxu0 }
 0x143   :  { %v285_v35 = vpop.f32.mrb[13].mxu0 }
 0x144   :  { %v883_v36 = vpop.f32.mrb[14].mxu0 }
 0x145   :  { %v307_v37 = vpack.c.bf16 %v883_v36, %v882_v34  ;;  %v288_v38 = vpop.f32.mrb[15].mxu0 }
 0x146   :  { %v306_v39 = vpack.c.bf16 %v288_v38, %v285_v35 }
 0x147   :  { %1127 = dma.done.wait [#allocation3], 1024 }
 0x148   :  { %1128 = vsyncadd [#allocation3], 4294966272  ;;  %885 = vmatpush3.bf16.msra.mxu1 %v300_v21  ;;  %v312_v40 = vld [vmem:[#allocation2] sm:$0xff]  ;;  %v1006_v42 = vld [vmem:[#allocation9 + $0x8] sm:$0xff]  }
 0x149   :  { %886 = vmatprep.subr.bf16.mxu1 %v301_v19  ;;  %900 = vmatprep.mubr.bf16.mxu1 %v312_v40  ;;  %v1005_v41 = vld [vmem:[#allocation9] sm:$0xff]   ;;  %v1007_v43 = vld [vmem:[#allocation9 + $0x10] sm:$0xff]   ;;  %v1008_v44 = vld [vmem:[#allocation9 + $0x18] sm:$0xff]  }
 0x14a   :  { %916 = vmatprep.subr.bf16.mxu0 %v1005_v41  ;;  %v1009_v45 = vld [vmem:[#allocation9 + $0x20] sm:$0xff]   ;;  %v1010_v46 = vld [vmem:[#allocation9 + $0x28] sm:$0xff]   ;;  %v1241_v48 = vld [vmem:[#allocation2 + $0x10] sm:$0xff] }
 0x14b   :  { %917 = vmatpush3.bf16.msra.mxu0 %v1005_v41  ;;  %v1239_v47 = vld [vmem:[#allocation2 + $0x8] sm:$0xff]  ;;  %v1245_v49 = vld [vmem:[#allocation2 + $0x18] sm:$0xff]  ;;  %v1247_v50 = vld [vmem:[#allocation2 + $0x20] sm:$0xff] }
 0x14c   :  { %887 = vmatpush3.bf16.msra.mxu1 %v301_v19  ;;  %918 = vmatprep.subr.bf16.mxu0 %v1006_v42  ;;  %v1251_v51 = vld [vmem:[#allocation2 + $0x28] sm:$0xff]  ;;  %v1253_v52 = vld [vmem:[#allocation2 + $0x30] sm:$0xff]  ;;  %v1257_v53 = vld [vmem:[#allocation2 + $0x38] sm:$0xff] }
 0x14d   :  { %888 = vmatprep.subr.bf16.mxu1 %v302_v27  ;;  %v1011_v54 = vld [vmem:[#allocation9 + $0x30] sm:$0xff]   ;;  %v1012_v55 = vld [vmem:[#allocation9 + $0x38] sm:$0xff]   ;;  %v777_v56 = vld [vmem:[%s1288_s3] ss:$0 sm:$0xff] }
 0x14f   :  { %919 = vmatpush3.bf16.msra.mxu0 %v1006_v42 }
 0x150   :  { %889 = vmatpush3.bf16.msra.mxu1 %v302_v27  ;;  %920 = vmatprep.subr.bf16.mxu0 %v1007_v43 }
 0x151   :  { %890 = vmatprep.subr.bf16.mxu1 %v303_v25 }
 0x153   :  { %921 = vmatpush3.bf16.msra.mxu0 %v1007_v43 }
 0x154   :  { %891 = vmatpush3.bf16.msra.mxu1 %v303_v25  ;;  %922 = vmatprep.subr.bf16.mxu0 %v1008_v44 }
 0x155   :  { %892 = vmatprep.subr.bf16.mxu1 %v304_v33 }
 0x157   :  { %923 = vmatpush3.bf16.msra.mxu0 %v1008_v44 }
 0x158   :  { %893 = vmatpush3.bf16.msra.mxu1 %v304_v33  ;;  %924 = vmatprep.subr.bf16.mxu0 %v1009_v45 }
 0x159   :  { %894 = vmatprep.subr.bf16.mxu1 %v305_v31 }
 0x15b   :  { %925 = vmatpush3.bf16.msra.mxu0 %v1009_v45 }
 0x15c   :  { %895 = vmatpush3.bf16.msra.mxu1 %v305_v31  ;;  %926 = vmatprep.subr.bf16.mxu0 %v1010_v46 }
 0x15d   :  { %896 = vmatprep.subr.bf16.mxu1 %v306_v39 }
 0x15f   :  { %927 = vmatpush3.bf16.msra.mxu0 %v1010_v46 }
 0x160   :  { %897 = vmatpush3.bf16.msra.mxu1 %v306_v39  ;;  %928 = vmatprep.subr.bf16.mxu0 %v1011_v54 }
 0x161   :  { %898 = vmatprep.subr.bf16.mxu1 %v307_v37 }
 0x163   :  { %929 = vmatpush3.bf16.msra.mxu0 %v1011_v54 }
 0x164   :  { %899 = vmatpush3.bf16.msra.mxu1 %v307_v37  ;;  %930 = vmatprep.subr.bf16.mxu0 %v1012_v55 }
 0x167   :  { %901 = vmatmul.mubr.bf16.vlgmr.msra.gmra.mrb[0].mxu1 %v1239_v47  ;;  %931 = vmatpush3.bf16.msra.mxu0 %v1012_v55 }
 0x168   :  { %904 = vmatprep.mubr.bf16.mxu1 %v1241_v48 }
 0x16f   :  { %905 = vmatmul.mubr.bf16.gmra.mrb[4].mxu1 %v1245_v49 }
 0x170   :  { %908 = vmatprep.mubr.bf16.mxu1 %v1247_v50 }
 0x177   :  { %909 = vmatmul.mubr.bf16.gmra.mrb[8].mxu1 %v1251_v51 }
 0x178   :  { %912 = vmatprep.mubr.bf16.mxu1 %v1253_v52 }
 0x17f   :  { %913 = vmatmul.mubr.bf16.gmra.mrb[12].mxu1 %v1257_v53 }
 0x180   :  { %964 = vmatprep.mubr.bf16.mxu1 %v312_v40 }
 0x23a   :  { %v902_v57 = vpop.f32.mrb[0].mxu1 }
 0x23b   :  { %v370_v58 = vadd.f32 %v902_v57, %v777_v56  ;;  %v361_v59 = vpop.f32.mrb[1].mxu1 }
 0x23c   :  { %v362_v60 = vadd.f32 %v777_v56, %v361_v59  ;;  %v903_v61 = vpop.f32.mrb[2].mxu1 }
 0x23d   :  { %v373_v62 = vadd.f32 %v903_v61, %v777_v56  ;;  %v364_v63 = vpop.f32.mrb[3].mxu1  ;;  %v426_v1 = vmax.f32 %v370_v58, 0.0 }
 0x23e   :  { %v365_v0 = vadd.f32 %v777_v56, %v364_v63  ;;  %v424_v3 = vmax.f32 %v362_v60, 0.0 }
 0x23f   :  { %v427_v2 = vmax.f32 %v373_v62, 0.0 }
 0x240   :  { %v425_v4 = vmax.f32 %v365_v0, 0.0 }
 0x241   :  { %v441_v5 = vpack.c.bf16 %v427_v2, %v426_v1 }
 0x242   :  { %v906_v6 = vpop.f32.mrb[4].mxu1  ;;  %v440_v7 = vpack.c.bf16 %v425_v4, %v424_v3 }
 0x243   :  { %v386_v8 = vadd.f32 %v906_v6, %v777_v56  ;;  %v377_v9 = vpop.f32.mrb[5].mxu1 }
 0x244   :  { %v378_v10 = vadd.f32 %v777_v56, %v377_v9  ;;  %v907_v11 = vpop.f32.mrb[6].mxu1  ;;  %932 = vmatprep.mubr.bf16.mxu0 %v440_v7 }
 0x245   :  { %v389_v12 = vadd.f32 %v907_v11, %v777_v56  ;;  %v380_v13 = vpop.f32.mrb[7].mxu1  ;;  %933 = vmatmul.mubr.bf16.vlgmr.msra.gmra.mrb[16].mxu0 %v441_v5  ;;  %v430_v15 = vmax.f32 %v386_v8, 0.0 }
 0x246   :  { %v381_v14 = vadd.f32 %v777_v56, %v380_v13  ;;  %v428_v17 = vmax.f32 %v378_v10, 0.0 }
 0x247   :  { %v431_v16 = vmax.f32 %v389_v12, 0.0 }
 0x248   :  { %v429_v18 = vmax.f32 %v381_v14, 0.0 }
 0x249   :  { %v443_v19 = vpack.c.bf16 %v431_v16, %v430_v15  ;;  %v786_v16 = vld [vmem:[%s1290_s5] ss:$0 sm:$0xff]  ;;  %s1137_s5 = smov [#allocation10]  }
 0x24a   :  { %v442_v20 = vpack.c.bf16 %v429_v18, %v428_v17  ;;  %v910_v21 = vpop.f32.mrb[8].mxu1  ;;  %s742_s21 = sshll.u32 %s1137_s5, 4  ;;  %s743_s21 = int_to_ptr.vmem [resolvable:$true] %s742_s21 }
 0x24b   :  { %v402_v22 = vadd.f32 %v910_v21, %v777_v56  ;;  %v393_v23 = vpop.f32.mrb[9].mxu1  ;;  %s1101_s22 = scalar_lea.vmem %s743_s21, 2048  ;;  %p1106_p5 = scmp.lt.s32.totalorder %s743_s21, %s743_s21 }
 0x24c   :  { %v394_v24 = vadd.f32 %v777_v56, %v393_v23  ;;  %v911_v25 = vpop.f32.mrb[10].mxu1  ;;  %936 = vmatprep.mubr.bf16.mxu0 %v442_v20  ;;  %p1102_p4 = scmp.ne.s32.totalorder %s743_s21, %s1101_s22  ;;  %p1107_p6 = scmp.lt.s32.totalorder %s1101_s22, %s1101_s22 }
 0x24d   :  { %v405_v26 = vadd.f32 %v911_v25, %v777_v56  ;;  %v396_v27 = vpop.f32.mrb[11].mxu1  ;;  %937 = vmatmul.mubr.bf16.gmra.mrb[20].mxu0 %v443_v19  ;;  %v434_v29 = vmax.f32 %v402_v22, 0.0 }
 0x24e   :  { %v397_v28 = vadd.f32 %v777_v56, %v396_v27  ;;  %v432_v31 = vmax.f32 %v394_v24, 0.0  ;;  %p1108_p7 = por %p1107_p6, %p1106_p5 }
 0x24f   :  { %v435_v30 = vmax.f32 %v405_v26, 0.0 }
 0x250   :  { %v433_v32 = vmax.f32 %v397_v28, 0.0  ;;  %p1109_p8 = pnand %p1108_p7, %p1102_p4 }
 0x251   :  { %v445_v33 = vpack.c.bf16 %v435_v30, %v434_v29 }
 0x252   :  { %v444_v34 = vpack.c.bf16 %v433_v32, %v432_v31  ;;  %v914_v35 = vpop.f32.mrb[12].mxu1 }
 0x253   :  { %v418_v36 = vadd.f32 %v914_v35, %v777_v56  ;;  %v409_v37 = vpop.f32.mrb[13].mxu1 }
 0x254   :  { %v410_v38 = vadd.f32 %v777_v56, %v409_v37  ;;  %v915_v39 = vpop.f32.mrb[14].mxu1  ;;  %940 = vmatprep.mubr.bf16.mxu0 %v444_v34 }
 0x255   :  { %v421_v40 = vadd.f32 %v915_v39, %v777_v56  ;;  %v412_v41 = vpop.f32.mrb[15].mxu1  ;;  %941 = vmatmul.mubr.bf16.gmra.mrb[24].mxu0 %v445_v33  ;;  %v438_v43 = vmax.f32 %v418_v36, 0.0 }
 0x256   :  { %v413_v42 = vadd.f32 %v777_v56, %v412_v41  ;;  %v436_v45 = vmax.f32 %v410_v38, 0.0 }
 0x257   :  { %v439_v44 = vmax.f32 %v421_v40, 0.0 }
 0x258   :  { %v437_v46 = vmax.f32 %v413_v42, 0.0 }
 0x259   :  { %v447_v54 = vpack.c.bf16 %v439_v44, %v438_v43 }
 0x25a   :  { %v446_v55 = vpack.c.bf16 %v437_v46, %v436_v45 }
 0x25c   :  { %944 = vmatprep.mubr.bf16.mxu0 %v446_v55 }
 0x25d   :  { %945 = vmatmul.mubr.bf16.gmra.mrb[28].mxu0 %v447_v54 }
 0x318   :  { %v934_v57 = vpop.f32.mrb[16].mxu0 }
 0x319   :  { %v546_v58 = vpop.f32.mrb[17].mxu0 }
 0x31a   :  { %v935_v59 = vpop.f32.mrb[18].mxu0 }
 0x31b   :  { %v610_v60 = vpack.c.bf16 %v935_v59, %v934_v57  ;;  %v549_v61 = vpop.f32.mrb[19].mxu0 }
 0x31c   :  { %v609_v62 = vpack.c.bf16 %v549_v61, %v546_v58 }
 0x31e   :  { %948 = vmatprep.subr.bf16.mxu1 %v609_v62 }
 0x31f   :  { %949 = vmatpush3.bf16.msra.mxu1 %v609_v62 }
 0x320   :  { %v938_v63 = vpop.f32.mrb[20].mxu0  ;;  %950 = vmatprep.subr.bf16.mxu1 %v610_v60 }
 0x321   :  { %v562_v0 = vpop.f32.mrb[21].mxu0 }
 0x322   :  { %v939_v56 = vpop.f32.mrb[22].mxu0 }
 0x323   :  { %v612_v1 = vpack.c.bf16 %v939_v56, %v938_v63  ;;  %v565_v2 = vpop.f32.mrb[23].mxu0  ;;  %951 = vmatpush3.bf16.msra.mxu1 %v610_v60 }
 0x324   :  { %v611_v3 = vpack.c.bf16 %v565_v2, %v562_v0 }
 0x326   :  { %952 = vmatprep.subr.bf16.mxu1 %v611_v3 }
 0x327   :  { %953 = vmatpush3.bf16.msra.mxu1 %v611_v3 }
 0x328   :  { %v942_v4 = vpop.f32.mrb[24].mxu0  ;;  %954 = vmatprep.subr.bf16.mxu1 %v612_v1 }
 0x329   :  { %v578_v5 = vpop.f32.mrb[25].mxu0 }
 0x32a   :  { %v943_v6 = vpop.f32.mrb[26].mxu0 }
 0x32b   :  { %v614_v7 = vpack.c.bf16 %v943_v6, %v942_v4  ;;  %v581_v8 = vpop.f32.mrb[27].mxu0  ;;  %955 = vmatpush3.bf16.msra.mxu1 %v612_v1 }
 0x32c   :  { %v613_v9 = vpack.c.bf16 %v581_v8, %v578_v5 }
 0x32e   :  { %956 = vmatprep.subr.bf16.mxu1 %v613_v9 }
 0x32f   :  { %957 = vmatpush3.bf16.msra.mxu1 %v613_v9 }
 0x330   :  { %v946_v10 = vpop.f32.mrb[28].mxu0  ;;  %958 = vmatprep.subr.bf16.mxu1 %v614_v7 }
 0x331   :  { %v594_v11 = vpop.f32.mrb[29].mxu0 }
 0x332   :  { %v947_v12 = vpop.f32.mrb[30].mxu0 }
 0x333   :  { %v616_v13 = vpack.c.bf16 %v947_v12, %v946_v10  ;;  %v597_v14 = vpop.f32.mrb[31].mxu0  ;;  %959 = vmatpush3.bf16.msra.mxu1 %v614_v7 }
 0x334   :  { %v615_v15 = vpack.c.bf16 %v597_v14, %v594_v11 }
 0x336   :  { %960 = vmatprep.subr.bf16.mxu1 %v615_v15 }
 0x337   :  { %961 = vmatpush3.bf16.msra.mxu1 %v615_v15 }
 0x338   :  { %962 = vmatprep.subr.bf16.mxu1 %v616_v13 }
 0x33b   :  { %963 = vmatpush3.bf16.msra.mxu1 %v616_v13 }
 0x33e   :  { %965 = vmatmul.mubr.bf16.vlgmr.msra.gmra.mrb[16].mxu1 %v1239_v47 }
 0x33f   :  { %968 = vmatprep.mubr.bf16.mxu1 %v1241_v48 }
 0x346   :  { %969 = vmatmul.mubr.bf16.gmra.mrb[20].mxu1 %v1245_v49 }
 0x347   :  { %972 = vmatprep.mubr.bf16.mxu1 %v1247_v50 }
 0x34e   :  { %973 = vmatmul.mubr.bf16.gmra.mrb[24].mxu1 %v1251_v51 }
 0x34f   :  { %976 = vmatprep.mubr.bf16.mxu1 %v1253_v52 }
 0x356   :  { %977 = vmatmul.mubr.bf16.gmra.mrb[28].mxu1 %v1257_v53 }
 0x411   :  { %v966_v17 = vpop.f32.mrb[16].mxu1 }
 0x412   :  { %v667_v18 = vadd.f32 %v966_v17, %v786_v16  ;;  %v658_v19 = vpop.f32.mrb[17].mxu1 }
 0x413   :  { %v659_v47 = vadd.f32 %v786_v16, %v658_v19  ;;  %v967_v20 = vpop.f32.mrb[18].mxu1 }
 0x414   :  { %723 = vst [vmem:[#allocation10 + $0x10] sm:$0xff] %v667_v18  ;;  %v670_v48 = vadd.f32 %v967_v20, %v786_v16  ;;  %v661_v49 = vpop.f32.mrb[19].mxu1 }
 0x415   :  { %721 = vst [vmem:[#allocation10] sm:$0xff] %v659_v47  ;;  %v662_v50 = vadd.f32 %v786_v16, %v661_v49 }
 0x416   :  { %724 = vst [vmem:[#allocation10 + $0x18] sm:$0xff] %v670_v48 }
 0x417   :  { %722 = vst [vmem:[#allocation10 + $0x8] sm:$0xff] %v662_v50 }
 0x419   :  { %v970_v51 = vpop.f32.mrb[20].mxu1 }
 0x41a   :  { %v683_v52 = vadd.f32 %v970_v51, %v786_v16  ;;  %v674_v21 = vpop.f32.mrb[21].mxu1 }
 0x41b   :  { %v675_v53 = vadd.f32 %v786_v16, %v674_v21  ;;  %v971_v22 = vpop.f32.mrb[22].mxu1 }
 0x41c   :  { %727 = vst [vmem:[#allocation10 + $0x30] sm:$0xff] %v683_v52  ;;  %v686_v23 = vadd.f32 %v971_v22, %v786_v16  ;;  %v677_v24 = vpop.f32.mrb[23].mxu1 }
 0x41d   :  { %725 = vst [vmem:[#allocation10 + $0x20] sm:$0xff] %v675_v53  ;;  %v678_v25 = vadd.f32 %v786_v16, %v677_v24 }
 0x41e   :  { %728 = vst [vmem:[#allocation10 + $0x38] sm:$0xff] %v686_v23 }
 0x41f   :  { %726 = vst [vmem:[#allocation10 + $0x28] sm:$0xff] %v678_v25 }
 0x421   :  { %v974_v26 = vpop.f32.mrb[24].mxu1 }
 0x422   :  { %v699_v27 = vadd.f32 %v974_v26, %v786_v16  ;;  %v690_v28 = vpop.f32.mrb[25].mxu1 }
 0x423   :  { %v691_v29 = vadd.f32 %v786_v16, %v690_v28  ;;  %v975_v30 = vpop.f32.mrb[26].mxu1 }
 0x424   :  { %731 = vst [vmem:[#allocation10 + $0x50] sm:$0xff] %v699_v27  ;;  %v702_v31 = vadd.f32 %v975_v30, %v786_v16  ;;  %v693_v32 = vpop.f32.mrb[27].mxu1 }
 0x425   :  { %729 = vst [vmem:[#allocation10 + $0x40] sm:$0xff] %v691_v29  ;;  %v694_v33 = vadd.f32 %v786_v16, %v693_v32 }
 0x426   :  { %732 = vst [vmem:[#allocation10 + $0x58] sm:$0xff] %v702_v31 }
 0x427   :  { %730 = vst [vmem:[#allocation10 + $0x48] sm:$0xff] %v694_v33 }
 0x429   :  { %v978_v34 = vpop.f32.mrb[28].mxu1 }
 0x42a   :  { %v715_v35 = vadd.f32 %v978_v34, %v786_v16  ;;  %v706_v36 = vpop.f32.mrb[29].mxu1 }
 0x42b   :  { %v707_v37 = vadd.f32 %v786_v16, %v706_v36  ;;  %v979_v38 = vpop.f32.mrb[30].mxu1 }
 0x42c   :  { %735 = vst [vmem:[#allocation10 + $0x70] sm:$0xff] %v715_v35  ;;  %v718_v39 = vadd.f32 %v979_v38, %v786_v16  ;;  %v709_v40 = vpop.f32.mrb[31].mxu1 }
 0x42d   :  { %733 = vst [vmem:[#allocation10 + $0x60] sm:$0xff] %v707_v37  ;;  %v710_v41 = vadd.f32 %v786_v16, %v709_v40 }
 0x42e   :  { %736 = vst [vmem:[#allocation10 + $0x78] sm:$0xff] %v718_v39 }
 0x42f   :  { %734 = vst [vmem:[#allocation10 + $0x68] sm:$0xff] %v710_v41 }
 0x430   :  { %1112 = shalt.err (!%p1109_p8)
}
 0x431   :  { %s1113_s26 = scalar_lea.hbm %s1291_s6, 2048 }
 0x432   :  { %p1114_p9 = scmp.ne.s32.totalorder %s1291_s6, %s1113_s26  ;;  %p1117_p10 = scmp.lt.u32.totalorder %s1113_s26, %s1291_s6 }
 0x434   :  { %p1119_p11 = pnand %p1117_p10, %p1114_p9 }
 0x436   :  { %1122 = shalt.err (!%p1119_p11)
}
 0x437   :  { %s1138_s7 = smov 128   ;;  %s1139_s8 = smov 8  }
 0x438   :  { %748 = dma.vmem_to_hbm [thread:$0]  %s743_s21, 2048, %s1291_s6, [#allocation6], %s1138_s7, %s1138_s7, %s1139_s8  }
 0x439   :  { %1129 = dma.done.wait [#allocation6], 2048  }
 0x43a   :  { %1130 = vsyncadd [#allocation6], 4294965248 }
 0x43b   :  { %752 = vsyncpa [#allocation5], 1 }
 0x43c   :  { %753 = vsyncpa [#allocation8], 1 }
 0x43d   :  { %754 = vsyncpa [#allocation6], 1 }
 0x43e   :  { %755 = vsyncmov [#allocation3] }
 0x441   :  { %s756_s4 = vpop.sfrf %755 }
 0x442   :  { %p787_p12 = scmp.ne.s32.totalorder %s756_s4, 0 }
 0x444   :  { %760 = shalt.err (%p787_p12)  }

</bundles_post_ra>
